<compile_context>
chip_gen: v6e
topology: v6e:2x2x1
jax: 0.10.0
libtpu: 0.0.40
codegen_flags: <defaults>
</compile_context>

<pallas_src>
import functools

import jax
import jax.numpy as jnp
from jax.experimental import pallas as pl
from jax.experimental.pallas import tpu as pltpu


def _focal_kernel(logits_ref, target_ref, w_ref, out_ref,
                  acc_num_ref, acc_den_ref, *, gamma):
    """One batch tile of FocalLoss.

    logits_ref : (C, TILE_N)  logits (any float dtype; upcast to f32 in-kernel)
    target_ref : (1, TILE_N)  int32 targets, -1 on padded lanes
    w_ref      : (C, 1)       f32 per-class CE weights (FocalLoss `alpha`)
    out_ref    : (1, 1)       f32 scalar loss (written on the last grid step)
    acc_num_ref: (1, TILE_N)  f32 running per-lane sum of w[target] * ce
    acc_den_ref: (1, TILE_N)  f32 running per-lane sum of w[target]
    """
    pid = pl.program_id(0)

    @pl.when(pid == 0)
    def _init():
        acc_num_ref[...] = jnp.zeros_like(acc_num_ref)
        acc_den_ref[...] = jnp.zeros_like(acc_den_ref)

    x = logits_ref[...].astype(jnp.float32)        # (C, TILE_N), f32 math (v5e)
    t = target_ref[...]                            # (1, TILE_N) int32
    w = w_ref[...].astype(jnp.float32)             # (C, 1)

    c, tn = x.shape
    cls = jax.lax.broadcasted_iota(jnp.int32, (c, tn), 0)
    mask = cls == t                                # all-False on padded lanes

    # log-softmax over classes (sublane axis).
    xmax = jnp.max(x, axis=0, keepdims=True)                                # (1, TILE_N)
    lse = xmax + jnp.log(jnp.sum(jnp.exp(x - xmax), axis=0, keepdims=True))
    tgt_logit = jnp.sum(jnp.where(mask, x, 0.0), axis=0, keepdims=True)
    ce = lse - tgt_logit                                                    # (1, TILE_N)

    # Per-sample CE weight w[target]; exactly 0 on padded lanes so they drop out.
    wi = jnp.sum(jnp.where(mask, w, 0.0), axis=0, keepdims=True)            # (1, TILE_N)

    acc_num_ref[...] += wi * ce
    acc_den_ref[...] += wi

    @pl.when(pid == pl.num_programs(0) - 1)
    def _finalize():
        num = jnp.sum(acc_num_ref[...], axis=1, keepdims=True)   # (1, 1)
        den = jnp.sum(acc_den_ref[...], axis=1, keepdims=True)   # (1, 1)
        # torch: logp = F.cross_entropy(output, target, alpha)  (weighted mean)
        logp = num / den
        p = jnp.exp(-logp)
        one_m_p = 1.0 - p
        if gamma == 2:
            mod = jnp.square(one_m_p)
        elif isinstance(gamma, int) and gamma >= 0:
            mod = jnp.ones_like(one_m_p)
            for _ in range(gamma):
                mod = mod * one_m_p
        else:
            mod = one_m_p ** gamma
        # torch.mean of a scalar is the scalar itself.
        out_ref[...] = mod * logp


def focal_loss(logits, target, alpha, *, gamma=2, tile_n=1024):
    """JAX/Pallas equivalent of FocalLoss(alpha, gamma).forward(logits, target)."""
    n, c = logits.shape
    assert alpha.shape == (c,), (
        f"Length of weight tensor must match the number of classes. "
        f"got {c} expected {alpha.shape[0]}")

    lane = 128
    tile_n = max(lane, (int(tile_n) // lane) * lane)
    n_pad = ((n + lane - 1) // lane) * lane
    if n_pad <= tile_n:
        tile_n = n_pad
    else:
        n_pad = ((n + tile_n - 1) // tile_n) * tile_n

    # Lane-dense layout: classes on sublanes, batch on lanes.  Keep the input
    # dtype (bf16 logits welcome; upcast happens in-kernel after the DMA).
    xt = jnp.transpose(logits)                               # (C, N)
    tgt = target.astype(jnp.int32)
    if n_pad != n:
        xt = jnp.pad(xt, ((0, 0), (0, n_pad - n)))
        tgt = jnp.pad(tgt, (0, n_pad - n), constant_values=-1)
    tgt = tgt.reshape(1, n_pad)
    w = alpha.astype(jnp.float32).reshape(c, 1)

    grid = (n_pad // tile_n,)
    kern = functools.partial(_focal_kernel, gamma=gamma)

    out = pl.pallas_call(
        kern,
        out_shape=jax.ShapeDtypeStruct((1, 1), jnp.float32),
        grid_spec=pltpu.PrefetchScalarGridSpec(
            num_scalar_prefetch=0,
            grid=grid,
            in_specs=[
                pl.BlockSpec((c, tile_n), lambda i: (0, i)),   # logits tile
                pl.BlockSpec((1, tile_n), lambda i: (0, i)),   # targets tile
                pl.BlockSpec((c, 1), lambda i: (0, 0)),        # weights, resident
            ],
            out_specs=pl.BlockSpec((1, 1), lambda i: (0, 0)),
            scratch_shapes=[
                pltpu.VMEM((1, tile_n), jnp.float32),          # sum w[t]*ce per lane
                pltpu.VMEM((1, tile_n), jnp.float32),          # sum w[t]    per lane
            ],
        ),
        compiler_params=pltpu.CompilerParams(
            dimension_semantics=("arbitrary",),      # reduction over batch tiles
            vmem_limit_bytes=32 * 1024 * 1024,       # explicit; safe on v5e/v6e/v7x
        ),
    )(xt, tgt, w)
    return out[0, 0]


def _focal_loss_ref(logits, target, alpha, gamma=2):
    """Pure-JAX reference mirroring the PyTorch module."""
    logits = logits.astype(jnp.float32)
    logp_all = jax.nn.log_softmax(logits, axis=-1)
    ce = -jnp.take_along_axis(logp_all, target[:, None], axis=-1)[:, 0]
    wi = alpha.astype(jnp.float32)[target]
    logp = jnp.sum(wi * ce) / jnp.sum(wi)    # weighted-mean cross entropy
    p = jnp.exp(-logp)
    return (1.0 - p) ** gamma * logp


if __name__ == "__main__":
    key = jax.random.PRNGKey(0)
    k_logits, k_target = jax.random.split(key)

    N, C = 8, 4
    logits = jax.random.normal(k_logits, (N, C), dtype=jnp.float32)
    target = jax.random.randint(k_target, (N,), 0, C, dtype=jnp.int32)
    alpha = jnp.array([0.1, 0.2, 0.3, 0.4], dtype=jnp.float32)  # per-class weights

    loss = focal_loss(logits, target, alpha, gamma=2)
    jax.block_until_ready(loss)

    ref = _focal_loss_ref(logits, target, alpha, gamma=2)
    assert jnp.allclose(loss, ref, rtol=1e-5, atol=1e-5), (loss, ref)

    # bf16 logits path (upcast happens in-kernel; halves HBM bytes for the
    # dominant input on real workloads).
    loss_bf16 = focal_loss(logits.astype(jnp.bfloat16), target, alpha, gamma=2)
    jax.block_until_ready(loss_bf16)

    print("KERNEL_OK")
</pallas_src>

<mosaic_0001>
module attributes {stable_mosaic.version = 11 : i64} {
  func.func @_focal_kernel(%arg0: i32, %arg1: memref<4x128xf32, #tpu.memory_space<vmem>>, %arg2: memref<1x128xi32, #tpu.memory_space<vmem>>, %arg3: memref<4x1xf32, #tpu.memory_space<vmem>>, %arg4: memref<1x1xf32, #tpu.memory_space<vmem>>, %arg5: memref<1x128xf32, #tpu.memory_space<vmem>>, %arg6: memref<1x128xf32, #tpu.memory_space<vmem>>) attributes {dimension_semantics = [#tpu.dimension_semantics<arbitrary>], iteration_bounds = array<i64: 1>, scalar_prefetch = 0 : i64, scratch_operands = 2 : i64, tpu.core_type = #tpu.core_type<tc>, window_params = [{transform_indices = @transform_0, window_bounds = array<i64: 4, 128>}, {transform_indices = @transform_1, window_bounds = array<i64: 1, 128>}, {pipeline_mode = #tpu.pipeline_mode<synchronous>, transform_indices = @transform_2, window_bounds = array<i64: 4, 1>}, {pipeline_mode = #tpu.pipeline_mode<synchronous>, transform_indices = @transform_3, window_bounds = array<i64: 1, 1>}]} {
    %c0_i32 = arith.constant 0 : i32
    %0 = arith.cmpi eq, %arg0, %c0_i32 : i32
    %1 = arith.extui %0 : i1 to i32
    %c0_i32_0 = arith.constant 0 : i32
    %2 = arith.cmpi ne, %1, %c0_i32_0 : i32
    scf.if %2 {
      %cst_21 = arith.constant 0.000000e+00 : f32
      %39 = vector.broadcast %cst_21 : f32 to vector<1x128xf32>
      %c0_22 = arith.constant 0 : index
      %c0_23 = arith.constant 0 : index
      %40 = vector.load %arg5[%c0_22, %c0_23] : memref<1x128xf32, #tpu.memory_space<vmem>>, vector<1x128xf32>
      tpu.vector_store %arg5[%c0_22, %c0_23], %39 {strides = array<i32>} : memref<1x128xf32, #tpu.memory_space<vmem>>, vector<1x128xf32>,
      %cst_24 = arith.constant 0.000000e+00 : f32
      %41 = vector.broadcast %cst_24 : f32 to vector<1x128xf32>
      %c0_25 = arith.constant 0 : index
      %c0_26 = arith.constant 0 : index
      %42 = vector.load %arg6[%c0_25, %c0_26] : memref<1x128xf32, #tpu.memory_space<vmem>>, vector<1x128xf32>
      tpu.vector_store %arg6[%c0_25, %c0_26], %41 {strides = array<i32>} : memref<1x128xf32, #tpu.memory_space<vmem>>, vector<1x128xf32>,
    } else {
    }
    %c0 = arith.constant 0 : index
    %c0_1 = arith.constant 0 : index
    %3 = vector.load %arg1[%c0, %c0_1] : memref<4x128xf32, #tpu.memory_space<vmem>>, vector<4x128xf32>
    %c0_2 = arith.constant 0 : index
    %c0_3 = arith.constant 0 : index
    %4 = vector.load %arg2[%c0_2, %c0_3] : memref<1x128xi32, #tpu.memory_space<vmem>>, vector<1x128xi32>
    %c0_4 = arith.constant 0 : index
    %c0_5 = arith.constant 0 : index
    %5 = vector.load %arg3[%c0_4, %c0_5] : memref<4x1xf32, #tpu.memory_space<vmem>>, vector<4x1xf32>
    %6 = tpu.iota {dimensions = array<i32: 0>} : vector<4x128xi32>
    %7 = vector.broadcast %4 : vector<1x128xi32> to vector<4x128xi32>
    %8 = arith.cmpi eq, %6, %7 : vector<4x128xi32>
    %cst = arith.constant dense<0xFF800000> : vector<128xf32>
    %9 = vector.multi_reduction <maximumf>, %3, %cst [0] : vector<4x128xf32> to vector<128xf32>
    %10 = vector.shape_cast %9 : vector<128xf32> to vector<1x128xf32>
    %11 = vector.broadcast %10 : vector<1x128xf32> to vector<4x128xf32>
    %12 = arith.subf %3, %11 : vector<4x128xf32>
    %13 = math.exp %12 : vector<4x128xf32>
    %cst_6 = arith.constant dense<0.000000e+00> : vector<128xf32>
    %14 = vector.multi_reduction <add>, %13, %cst_6 [0] : vector<4x128xf32> to vector<128xf32>
    %15 = vector.shape_cast %14 : vector<128xf32> to vector<1x128xf32>
    %16 = math.log %15 : vector<1x128xf32>
    %17 = arith.addf %10, %16 : vector<1x128xf32>
    %cst_7 = arith.constant 0.000000e+00 : f32
    %18 = vector.broadcast %cst_7 : f32 to vector<4x128xf32>
    %19 = arith.select %8, %3, %18 : vector<4x128xi1>, vector<4x128xf32>
    %cst_8 = arith.constant dense<0.000000e+00> : vector<128xf32>
    %20 = vector.multi_reduction <add>, %19, %cst_8 [0] : vector<4x128xf32> to vector<128xf32>
    %21 = vector.shape_cast %20 : vector<128xf32> to vector<1x128xf32>
    %22 = arith.subf %17, %21 : vector<1x128xf32>
    %cst_9 = arith.constant 0.000000e+00 : f32
    %23 = vector.shape_cast %5 : vector<4x1xf32> to vector<4x1xf32>
    %24 = vector.broadcast %23 : vector<4x1xf32> to vector<4x128xf32>
    %25 = vector.broadcast %cst_9 : f32 to vector<4x128xf32>
    %26 = arith.select %8, %24, %25 : vector<4x128xi1>, vector<4x128xf32>
    %cst_10 = arith.constant dense<0.000000e+00> : vector<128xf32>
    %27 = vector.multi_reduction <add>, %26, %cst_10 [0] : vector<4x128xf32> to vector<128xf32>
    %28 = vector.shape_cast %27 : vector<128xf32> to vector<1x128xf32>
    %c0_11 = arith.constant 0 : index
    %c0_12 = arith.constant 0 : index
    %29 = vector.load %arg5[%c0_11, %c0_12] : memref<1x128xf32, #tpu.memory_space<vmem>>, vector<1x128xf32>
    %30 = arith.mulf %28, %22 : vector<1x128xf32>
    %31 = arith.addf %29, %30 : vector<1x128xf32>
    %c0_13 = arith.constant 0 : index
    %c0_14 = arith.constant 0 : index
    %32 = vector.load %arg5[%c0_13, %c0_14] : memref<1x128xf32, #tpu.memory_space<vmem>>, vector<1x128xf32>
    tpu.vector_store %arg5[%c0_13, %c0_14], %31 {strides = array<i32>} : memref<1x128xf32, #tpu.memory_space<vmem>>, vector<1x128xf32>,
    %c0_15 = arith.constant 0 : index
    %c0_16 = arith.constant 0 : index
    %33 = vector.load %arg6[%c0_15, %c0_16] : memref<1x128xf32, #tpu.memory_space<vmem>>, vector<1x128xf32>
    %34 = arith.addf %33, %28 : vector<1x128xf32>
    %c0_17 = arith.constant 0 : index
    %c0_18 = arith.constant 0 : index
    %35 = vector.load %arg6[%c0_17, %c0_18] : memref<1x128xf32, #tpu.memory_space<vmem>>, vector<1x128xf32>
    tpu.vector_store %arg6[%c0_17, %c0_18], %34 {strides = array<i32>} : memref<1x128xf32, #tpu.memory_space<vmem>>, vector<1x128xf32>,
    %c0_i32_19 = arith.constant 0 : i32
    %36 = arith.cmpi eq, %arg0, %c0_i32_19 : i32
    %37 = arith.extui %36 : i1 to i32
    %c0_i32_20 = arith.constant 0 : i32
    %38 = arith.cmpi ne, %37, %c0_i32_20 : i32
    scf.if %38 {
      %c0_21 = arith.constant 0 : index
      %c0_22 = arith.constant 0 : index
      %39 = vector.load %arg5[%c0_21, %c0_22] : memref<1x128xf32, #tpu.memory_space<vmem>>, vector<1x128xf32>
      %cst_23 = arith.constant dense<0.000000e+00> : vector<1xf32>
      %40 = vector.multi_reduction <add>, %39, %cst_23 [1] : vector<1x128xf32> to vector<1xf32>
      %41 = vector.shape_cast %40 : vector<1xf32> to vector<1x1xf32>
      %c0_24 = arith.constant 0 : index
      %c0_25 = arith.constant 0 : index
      %42 = vector.load %arg6[%c0_24, %c0_25] : memref<1x128xf32, #tpu.memory_space<vmem>>, vector<1x128xf32>
      %cst_26 = arith.constant dense<0.000000e+00> : vector<1xf32>
      %43 = vector.multi_reduction <add>, %42, %cst_26 [1] : vector<1x128xf32> to vector<1xf32>
      %44 = vector.shape_cast %43 : vector<1xf32> to vector<1x1xf32>
      %45 = arith.divf %41, %44 : vector<1x1xf32>
      %cst_27 = arith.constant 0.000000e+00 : f32
      %46 = vector.broadcast %cst_27 : f32 to vector<1x1xf32>
      %47 = arith.subf %46, %45 : vector<1x1xf32>
      %48 = math.exp %47 : vector<1x1xf32>
      %cst_28 = arith.constant 1.000000e+00 : f32
      %49 = vector.broadcast %cst_28 : f32 to vector<1x1xf32>
      %50 = arith.subf %49, %48 : vector<1x1xf32>
      %51 = arith.mulf %50, %50 : vector<1x1xf32>
      %52 = arith.mulf %51, %45 : vector<1x1xf32>
      %c0_29 = arith.constant 0 : index
      %c0_30 = arith.constant 0 : index
      %53 = vector.load %arg4[%c0_29, %c0_30] : memref<1x1xf32, #tpu.memory_space<vmem>>, vector<1x1xf32>
      tpu.vector_store %arg4[%c0_29, %c0_30], %52 {strides = array<i32>} : memref<1x1xf32, #tpu.memory_space<vmem>>, vector<1x1xf32>,
    } else {
    }
    return
  }
  func.func @transform_0(%arg0: i32) -> (i32, i32) {
    %c0_i32 = arith.constant 0 : i32
    %c0_i32_0 = arith.constant 0 : i32
    return %c0_i32, %arg0 : i32, i32
  }
  func.func @transform_1(%arg0: i32) -> (i32, i32) {
    %c0_i32 = arith.constant 0 : i32
    %c0_i32_0 = arith.constant 0 : i32
    return %c0_i32, %arg0 : i32, i32
  }
  func.func @transform_2(%arg0: i32) -> (i32, i32) {
    %c0_i32 = arith.constant 0 : i32
    %c0_i32_0 = arith.constant 0 : i32
    %c0_i32_1 = arith.constant 0 : i32
    return %c0_i32, %c0_i32_0 : i32, i32
  }
  func.func @transform_3(%arg0: i32) -> (i32, i32) {
    %c0_i32 = arith.constant 0 : i32
    %c0_i32_0 = arith.constant 0 : i32
    %c0_i32_1 = arith.constant 0 : i32
    return %c0_i32, %c0_i32_0 : i32, i32
  }
}

</mosaic_0001>

<bundles_post_ra>
// kernel: tpu_custom_call.1
= control target key start
LH: loop header
LB: loop body
LE: loop exit
PB: predicated region body
PF: predicated region fallthrough
CT: control target
= control target key end

     0   :  { %v152_v1 = vmov 0   ;;  %v153_v2 = vmov 0.0   ;;  %s191_s0 = inlined_call_operand.vmem [shape: f32[4,128], index: 0, kind: input, shape index: {}]   ;;  %s192_s1 = inlined_call_operand.vmem [shape: s32[1,128], index: 1, kind: input, shape index: {}]   ;;  %s193_s2 = inlined_call_operand.vmem [shape: f32[4,1], index: 2, kind: input, shape index: {}]   ;;  %s194_s3 = inlined_call_operand.hbm [shape: f32[1,1], index: 3, kind: output, shape index: {}]  }
   0x1   :  { %v23_v0 = vld [vmem:[%s193_s2] sm:$0xf]  ;;  %121 = vset.pattern.permute.xlu0 %v152_v1  ;;  %19 = vst [vmem:[#allocation2] sm:$0x1] %v153_v2  ;;  %20 = vst [vmem:[#allocation3] sm:$0x1] %v153_v2 }
   0x2   :  { %8 = vsyncpa [#allocation5], 0  ;;  %63 = vperm.xlu0 %121, %v23_v0   ;;  %vm31_vm0 = vcmask 1043456   ;;  %v21_v3 = vld [vmem:[%s191_s0] sm:$0xf]  ;;  %v24_v17 = vlaneseq  ;;  %vm85_vm2 = vcmask 1040384  }
   0x3   :  { %v32_v4 = vsel %vm31_vm0, %v21_v3, -inf  ;;  %v117_v20 = vld [vmem:[%s192_s1] ss:$0 sm:$0xff]  ;;  %s154_s1 = smov [#allocation4]   ;;  %vm101_vm3 = vcmask 0  }
   0x4   :  { %v33_v5 = vrot.slane %v32_v4, 4  ;;  %v25_v19 = vshrl.u32 %v24_v17, 7  ;;  %s109_s16 = sshll.u32 %s154_s1, 4  ;;  %s110_s16 = int_to_ptr.vmem [resolvable:$true] %s109_s16 }
   0x5   :  { %s130_s17 = scalar_lea.vmem %s110_s16, 16  ;;  %s134_s18 = scalar_lea.vmem %s110_s16, 32 }
   0x6   :  { %v34_v6 = vmax.f32 %v32_v4, %v33_v5  ;;  %vm30_vm1 = vcmp.eq.s32.totalorder %v25_v19, %v117_v20  ;;  %p131_p0 = scmp.ne.s32.totalorder %s110_s16, %s130_s17  ;;  %p135_p1 = scmp.lt.s32.totalorder %s110_s16, %s110_s16 }
   0x7   :  { %v52_v23 = vsel %vm30_vm1, %v21_v3, 0.0  ;;  %p136_p2 = scmp.lt.s32.totalorder %s134_s18, %s130_s17 }
   0x8   :  { %v35_v7 = vrot.slane %v34_v6, 2  ;;  %v53_v25 = vsel %vm31_vm0, %v52_v23, 0.0  ;;  %v78_v44 = vld [vmem:[#allocation3] sm:$0x1]  ;;  %v74_v46 = vld [vmem:[#allocation2] sm:$0x1] }
   0x9   :  { %v54_v26 = vrot.slane %v53_v25, 4  ;;  %p137_p3 = por %p136_p2, %p135_p1 }
   0xa   :  { %v36_v8 = vmax.f32 %v34_v6, %v35_v7 }
   0xb   :  { %v55_v27 = vadd.f32 %v54_v26, %v53_v25  ;;  %p138_p4 = pnand %p137_p3, %p131_p0 }
   0xc   :  { %v37_v9 = vrot.slane %v36_v8, 1 }
   0xd   :  { %v56_v28 = vrot.slane %v55_v27, 2 }
   0xe   :  { %v38_v10 = vmax.f32 %v36_v8, %v37_v9 }
   0xf   :  { %v57_v29 = vadd.f32 %v56_v28, %v55_v27 }
  0x10   :  { %v39_v11 = vsub.f32 %v21_v3, %v38_v10 }
  0x11   :  { %v58_v35 = vrot.slane %v57_v29, 1 }
  0x12   :  { %v40_v12 = vmul.f32 1.442695, %v39_v11 }
  0x13   :  { %v59_v39 = vadd.f32 %v58_v35, %v57_v29 }
  0x14   :  { %122 = vpow2.f32 %v40_v12 }
  0x21   :  { %v123_v13 = vpop.eup %122 }
  0x22   :  { %v42_v14 = vsel %vm31_vm0, %v123_v13, 0.0 }
  0x23   :  { %v43_v15 = vrot.slane %v42_v14, 4 }
  0x25   :  { %v44_v16 = vadd.f32 %v43_v15, %v42_v14 }
  0x27   :  { %v45_v18 = vrot.slane %v44_v16, 2 }
  0x29   :  { %v46_v21 = vadd.f32 %v45_v18, %v44_v16 }
  0x2b   :  { %v47_v22 = vrot.slane %v46_v21, 1 }
  0x2d   :  { %v48_v24 = vadd.f32 %v47_v22, %v46_v21 }
  0x2f   :  { %124 = vlog2.f32 %v48_v24 }
  0x3c   :  { %v125_v30 = vpop.eup %124 }
  0x3d   :  { %v50_v34 = vmul.f32 0.6931472, %v125_v30 }
  0x3f   :  { %v51_v38 = vadd.f32 %v50_v34, %v38_v10 }
  0x41   :  { %v60_v42 = vsub.f32 %v51_v38, %v59_v39 }
  0x7d   :  { %v64_v31 = vpop.permute.xlu0 %63 }
  0x7e   :  { %v66_v32 = vsel %vm30_vm1, %v64_v31, 0.0 }
  0x7f   :  { %v67_v33 = vsel %vm31_vm0, %v66_v32, 0.0 }
  0x80   :  { %v68_v36 = vrot.slane %v67_v33, 4 }
  0x82   :  { %v69_v37 = vadd.f32 %v68_v36, %v67_v33 }
  0x84   :  { %v70_v40 = vrot.slane %v69_v37, 2 }
  0x86   :  { %v71_v41 = vadd.f32 %v70_v40, %v69_v37 }
  0x88   :  { %v72_v43 = vrot.slane %v71_v41, 1 }
  0x8a   :  { %v73_v45 = vadd.f32 %v72_v43, %v71_v41 }
  0x8c   :  { %v75_v47 = vmul.f32 %v73_v45, %v60_v42  ;;  %v79_v48 = vadd.f32 %v78_v44, %v73_v45 }
  0x8e   :  { %v76_v49 = vadd.f32 %v75_v47, %v74_v46  ;;  %80 = vst [vmem:[#allocation3] sm:$0x1] %v79_v48 }
  0x90   :  { %77 = vst [vmem:[#allocation2] sm:$0x1] %v76_v49 }
  0x95   :  { %v89_v50 = vld [vmem:[#allocation3] sm:$0x1] }
  0x96   :  { %v90_v51 = vsel %vm85_vm2, %v89_v50, 0.0 }
  0x97   :  { %91 = vadd.xlane.f32.xlu0 %v90_v51  ;;  %v84_v52 = vld [vmem:[#allocation2] sm:$0x1] }
  0x98   :  { %v86_v53 = vsel %vm85_vm2, %v84_v52, 0.0 }
  0x99   :  { %87 = vadd.xlane.f32.xlu1 %v86_v53 }
 0x120   :  { %v92_v54 = vpop.xlane.xlu0 %91 }
 0x121   :  { %126 = vrcp.f32 %v92_v54 }
 0x122   :  { %v88_v56 = vpop.xlane.xlu1 %87 }
 0x12e   :  { %v127_v55 = vpop.eup %126 }
 0x12f   :  { %v94_v57 = vmul.f32 %v127_v55, %v88_v56 }
 0x131   :  { %v95_v58 = vsub.f32 0.0, %v94_v57 }
 0x133   :  { %v96_v59 = vmul.f32 1.442695, %v95_v58 }
 0x135   :  { %128 = vpow2.f32 %v96_v59 }
 0x142   :  { %v129_v60 = vpop.eup %128 }
 0x143   :  { %v98_v61 = vsub.f32 1.0, %v129_v60 }
 0x145   :  { %v99_v62 = vmul.f32 %v98_v61, %v98_v61 }
 0x147   :  { %v100_v63 = vmul.f32 %v99_v62, %v94_v57 }
 0x149   :  { %102 = vst.msk [vmem:[#allocation4] sm:$0x1] %vm101_vm3, %v100_v63 }
 0x14a   :  { %141 = shalt.err (!%p138_p4)
}
 0x14b   :  { %112 = dma.vmem_to_hbm [thread:$0]  %s110_s16, 16, %s194_s3, [#allocation5]  }
 0x14c   :  { %150 = dma.done.wait [#allocation5], 16  }
 0x14d   :  { %151 = vsyncadd [#allocation5], 4294967280 }
 0x14e   :  { %116 = vsyncpa [#allocation5], 1 }

</bundles_post_ra>
